<compile_context>
chip_gen: v7x
topology: tpu7x:2x2x1
jax: 0.10.0
libtpu: 0.0.40
codegen_flags: <defaults>
</compile_context>

<pallas_src>
import functools

import jax
import jax.numpy as jnp
from jax.experimental import pallas as pl
from jax.experimental.pallas import tpu as pltpu


def _round_up(x, m):
    return ((x + m - 1) // m) * m


def _default_per_buffer_budget():
    """Per-buffer f32 x-tile budget, derived from the chip's VMEM capacity."""
    cap = 64 << 20  # conservative default = v7x per-TensorCore VMEM
    try:
        info = pltpu.get_tpu_info()
        cap = int(getattr(info, "vmem_capacity_bytes", cap) or cap)
    except Exception:
        pass
    if cap <= (64 << 20):
        # v7x: 64 MiB physical -> 2 x 12 MiB double-buffered x + extras ~ 26 MiB.
        return 12 << 20
    # v5e / v6e: 128 MiB physical -> 2 x 16 MiB + extras ~ 34 MiB.
    return 16 << 20


def _choose_tiles(B, D, per_buffer_budget):
    """Pick (tb, td): batch-tile rows and feature (reduction) tile width so one
    f32 x tile (tb, td) fits in per_buffer_budget bytes."""
    elt = 4  # f32
    b_ceil = _round_up(B, 8)
    rows_pref = min(128, b_ceil)

    if rows_pref * D * elt <= per_buffer_budget:
        td = D  # common case: feature dim fits whole -> no reduction tiling
    else:
        td = (per_buffer_budget // (rows_pref * elt)) // 128 * 128
        td = max(128, min(td, _round_up(D, 128)))
        if td >= D:
            td = D

    tb = per_buffer_budget // (td * elt)
    tb = min(tb, b_ceil)
    if tb >= 128:
        tb = (tb // 128) * 128
        # If a single tile would cover the whole batch but the batch is big,
        # split so the "parallel" axis has >=2 steps (v7x megacore).
        if tb >= b_ceil and B > 128:
            tb = max(128, _round_up((B + 1) // 2, 128))
    else:
        tb = max(8, (tb // 8) * 8)
    return tb, td


def _logreg_kernel(x_ref, w_ref, b_ref, o_ref, acc_ref, *,
                   d_total, td, num_k, needs_mask):
    # x_ref: (tb, td) VMEM (streamed)     w_ref: (1, td) VMEM
    # b_ref: (1, 1)   SMEM scalar         o_ref: (1, tb) VMEM (lane-dense row)
    # acc_ref: (1, tb) f32 VMEM scratch, resident across the k (reduction) axis.
    k = pl.program_id(1)

    @pl.when(k == 0)
    def _():
        acc_ref[...] = jnp.zeros_like(acc_ref)

    x = x_ref[...]
    w = w_ref[...]
    if needs_mask:
        # Boundary D block over-extends the array; zero the invalid lanes so
        # garbage reads never pollute the reduction.
        lane = k * td + jax.lax.broadcasted_iota(jnp.int32, (1, td), 1)
        valid = lane < d_total
        w = jnp.where(valid, w, 0.0)
        x = jnp.where(valid, x, 0.0)

    acc_ref[...] += jax.lax.dot_general(
        w, x,
        dimension_numbers=(((1,), (1,)), ((), ())),   # contract feature dims
        preferred_element_type=jnp.float32,
    )  # (1, tb)

    @pl.when(k == num_k - 1)
    def _():
        logits = acc_ref[...] + b_ref[0, 0]           # scalar bias from SMEM
        o_ref[...] = jax.nn.sigmoid(logits).astype(o_ref.dtype)


def logistic_regression(x, w, b, *, force_pallas=False,
                        per_buffer_budget_bytes=None):
    """x: (B, D) f32, w: (1, D) f32 (nn.Linear weight layout), b: (1,) f32
    -> (B, 1) f32."""
    B, D = x.shape
    assert w.shape == (1, D)
    x = x.astype(jnp.float32)
    w = w.astype(jnp.float32)

    # Tiny problems: pallas_call launch overhead dominates; let XLA fuse it.
    if not force_pallas and B * D < (1 << 16):
        return jax.nn.sigmoid(x @ w.T + b[None, :].astype(jnp.float32))

    budget = per_buffer_budget_bytes or _default_per_buffer_budget()
    tb, td = _choose_tiles(B, D, budget)
    num_b = pl.cdiv(B, tb)
    num_k = pl.cdiv(D, td)
    needs_mask = (D % td) != 0

    b_smem = jnp.reshape(b, (1, 1)).astype(jnp.float32)

    kernel = functools.partial(
        _logreg_kernel, d_total=D, td=td, num_k=num_k, needs_mask=needs_mask)

    # Double-buffered x tile + double-buffered W tile + out + acc + slack.
    vmem_need = 2 * tb * td * 4 + 2 * td * 4 + 3 * tb * 4 + (2 << 20)
    vmem_limit = int(max(vmem_need, 16 << 20))

    out = pl.pallas_call(
        kernel,
        out_shape=jax.ShapeDtypeStruct((1, num_b * tb), jnp.float32),
        grid_spec=pltpu.PrefetchScalarGridSpec(
            num_scalar_prefetch=0,
            grid=(num_b, num_k),                                  # reduction last
            in_specs=[
                pl.BlockSpec((tb, td), lambda i, k: (i, k)),      # stream x
                pl.BlockSpec((1, td), lambda i, k: (0, k)),       # W (resident)
                pl.BlockSpec(memory_space=pltpu.MemorySpace.SMEM),  # bias scalar
            ],
            out_specs=pl.BlockSpec((1, tb), lambda i, k: (0, i)),  # lane-dense
            scratch_shapes=[pltpu.VMEM((1, tb), jnp.float32)],
        ),
        compiler_params=pltpu.CompilerParams(
            dimension_semantics=("parallel", "arbitrary"),
            vmem_limit_bytes=vmem_limit,
        ),
    )(x, w, b_smem)

    # (1, num_b*tb) lane-dense slab -> (B, 1), dropping boundary-tile garbage.
    return out.reshape(-1)[:B].reshape(B, 1)


if __name__ == "__main__":
    key = jax.random.PRNGKey(0)
    kx, kw, kb = jax.random.split(key, 3)

    # Shapes implied by the module: x (batch, input_size) -> (batch, 1).
    batch, input_size = 8, 32
    bound = 1.0 / (input_size ** 0.5)
    x = jax.random.normal(kx, (batch, input_size), dtype=jnp.float32)
    w = jax.random.uniform(kw, (1, input_size), minval=-bound, maxval=bound,
                           dtype=jnp.float32)
    b = jax.random.uniform(kb, (1,), minval=-bound, maxval=bound,
                           dtype=jnp.float32)

    out = jax.block_until_ready(logistic_regression(x, w, b, force_pallas=True))
    ref = jax.nn.sigmoid(x @ w.T + b[None, :])
    assert out.shape == (batch, 1)
    assert jnp.allclose(out, ref, atol=1e-5, rtol=1e-5)

    # Multi-batch-tile path (B not a multiple of the tile; no jnp.pad pre-pass).
    B2, D2 = 300, 64
    x2 = jax.random.normal(kx, (B2, D2), dtype=jnp.float32)
    w2 = jax.random.uniform(kw, (1, D2), minval=-0.1, maxval=0.1,
                            dtype=jnp.float32)
    out2 = jax.block_until_ready(logistic_regression(x2, w2, b,
                                                     force_pallas=True))
    ref2 = jax.nn.sigmoid(x2 @ w2.T + b[None, :])
    assert out2.shape == (B2, 1)
    assert jnp.allclose(out2, ref2, atol=1e-5, rtol=1e-5)

    # Feature-dim (reduction) tiling path with a masked boundary K block
    # (small per-buffer budget forces the large-D code path at a small shape).
    B3, D3 = 64, 500
    x3 = jax.random.normal(kx, (B3, D3), dtype=jnp.float32)
    w3 = jax.random.uniform(kw, (1, D3), minval=-0.05, maxval=0.05,
                            dtype=jnp.float32)
    out3 = jax.block_until_ready(
        logistic_regression(x3, w3, b, force_pallas=True,
                            per_buffer_budget_bytes=64 * 1024))
    ref3 = jax.nn.sigmoid(x3 @ w3.T + b[None, :])
    assert out3.shape == (B3, 1)
    assert jnp.allclose(out3, ref3, atol=1e-5, rtol=1e-5)

    print("KERNEL_OK")
</pallas_src>

<mosaic_0001>
module attributes {stable_mosaic.version = 11 : i64} {
  func.func @_logreg_kernel(%arg0: i32, %arg1: i32, %arg2: memref<8x32xf32, #tpu.memory_space<vmem>>, %arg3: memref<1x32xf32, #tpu.memory_space<vmem>>, %arg4: memref<1x1xf32, #tpu.memory_space<smem>>, %arg5: memref<1x8xf32, #tpu.memory_space<vmem>>, %arg6: memref<1x8xf32, #tpu.memory_space<vmem>>) attributes {dimension_semantics = [#tpu.dimension_semantics<parallel>, #tpu.dimension_semantics<arbitrary>], iteration_bounds = array<i64: 1, 1>, scalar_prefetch = 0 : i64, scratch_operands = 1 : i64, tpu.core_type = #tpu.core_type<tc>, window_params = [{transform_indices = @transform_0, window_bounds = array<i64: 8, 32>}, {transform_indices = @transform_1, window_bounds = array<i64: 1, 32>}, {transform_indices = @transform_2, window_bounds = array<i64: 1, 1>}, {transform_indices = @transform_3, window_bounds = array<i64: 1, 8>}]} {
    %c0_i32 = arith.constant 0 : i32
    %0 = arith.cmpi eq, %arg1, %c0_i32 : i32
    %1 = arith.extui %0 : i1 to i32
    %c0_i32_0 = arith.constant 0 : i32
    %2 = arith.cmpi ne, %1, %c0_i32_0 : i32
    scf.if %2 {
      %cst_10 = arith.constant 0.000000e+00 : f32
      %12 = vector.broadcast %cst_10 : f32 to vector<1x8xf32>
      %c0_11 = arith.constant 0 : index
      %c0_12 = arith.constant 0 : index
      %13 = vector.load %arg6[%c0_11, %c0_12] : memref<1x8xf32, #tpu.memory_space<vmem>>, vector<1x8xf32>
      tpu.vector_store %arg6[%c0_11, %c0_12], %12 {strides = array<i32>} : memref<1x8xf32, #tpu.memory_space<vmem>>, vector<1x8xf32>,
    } else {
    }
    %c0 = arith.constant 0 : index
    %c0_1 = arith.constant 0 : index
    %3 = vector.load %arg2[%c0, %c0_1] : memref<8x32xf32, #tpu.memory_space<vmem>>, vector<8x32xf32>
    %c0_2 = arith.constant 0 : index
    %c0_3 = arith.constant 0 : index
    %4 = vector.load %arg3[%c0_2, %c0_3] : memref<1x32xf32, #tpu.memory_space<vmem>>, vector<1x32xf32>
    %c0_4 = arith.constant 0 : index
    %c0_5 = arith.constant 0 : index
    %5 = vector.load %arg6[%c0_4, %c0_5] : memref<1x8xf32, #tpu.memory_space<vmem>>, vector<1x8xf32>
    %cst = arith.constant dense<0.000000e+00> : vector<1x8xf32>
    %6 = tpu.matmul %4, %3, %cst {dimension_numbers = #tpu.dot_dimension_numbers<[1], [1], [0], [0], [0, 0, 1, 0], [], []>} : vector<1x32xf32>, vector<8x32xf32>, vector<1x8xf32> -> vector<1x8xf32>
    %7 = arith.addf %5, %6 : vector<1x8xf32>
    %c0_6 = arith.constant 0 : index
    %c0_7 = arith.constant 0 : index
    %8 = vector.load %arg6[%c0_6, %c0_7] : memref<1x8xf32, #tpu.memory_space<vmem>>, vector<1x8xf32>
    tpu.vector_store %arg6[%c0_6, %c0_7], %7 {strides = array<i32>} : memref<1x8xf32, #tpu.memory_space<vmem>>, vector<1x8xf32>,
    %c0_i32_8 = arith.constant 0 : i32
    %9 = arith.cmpi eq, %arg1, %c0_i32_8 : i32
    %10 = arith.extui %9 : i1 to i32
    %c0_i32_9 = arith.constant 0 : i32
    %11 = arith.cmpi ne, %10, %c0_i32_9 : i32
    scf.if %11 {
      %c0_10 = arith.constant 0 : index
      %c0_11 = arith.constant 0 : index
      %12 = vector.load %arg6[%c0_10, %c0_11] : memref<1x8xf32, #tpu.memory_space<vmem>>, vector<1x8xf32>
      %c0_12 = arith.constant 0 : index
      %c0_13 = arith.constant 0 : index
      %13 = memref.load %arg4[%c0_12, %c0_13] : memref<1x1xf32, #tpu.memory_space<smem>>
      %14 = vector.broadcast %13 : f32 to vector<1x8xf32>
      %15 = arith.addf %12, %14 : vector<1x8xf32>
      %16 = arith.negf %15 : vector<1x8xf32>
      %17 = math.exp %16 : vector<1x8xf32>
      %cst_14 = arith.constant 1.000000e+00 : f32
      %18 = vector.broadcast %cst_14 : f32 to vector<1x8xf32>
      %19 = arith.addf %18, %17 : vector<1x8xf32>
      %20 = arith.divf %18, %19 : vector<1x8xf32>
      %c0_15 = arith.constant 0 : index
      %c0_16 = arith.constant 0 : index
      %21 = vector.load %arg5[%c0_15, %c0_16] : memref<1x8xf32, #tpu.memory_space<vmem>>, vector<1x8xf32>
      tpu.vector_store %arg5[%c0_15, %c0_16], %20 {strides = array<i32>} : memref<1x8xf32, #tpu.memory_space<vmem>>, vector<1x8xf32>,
    } else {
    }
    return
  }
  func.func @transform_0(%arg0: i32, %arg1: i32) -> (i32, i32) {
    %c0_i32 = arith.constant 0 : i32
    return %arg0, %arg1 : i32, i32
  }
  func.func @transform_1(%arg0: i32, %arg1: i32) -> (i32, i32) {
    %c0_i32 = arith.constant 0 : i32
    %c0_i32_0 = arith.constant 0 : i32
    return %c0_i32, %arg1 : i32, i32
  }
  func.func @transform_2(%arg0: i32, %arg1: i32) -> (i32, i32) {
    %c0_i32 = arith.constant 0 : i32
    %c0_i32_0 = arith.constant 0 : i32
    %c0_i32_1 = arith.constant 0 : i32
    return %c0_i32, %c0_i32_0 : i32, i32
  }
  func.func @transform_3(%arg0: i32, %arg1: i32) -> (i32, i32) {
    %c0_i32 = arith.constant 0 : i32
    %c0_i32_0 = arith.constant 0 : i32
    return %c0_i32, %arg0 : i32, i32
  }
}

</mosaic_0001>

<bundles_post_ra>
// kernel: tpu_custom_call.1
= control target key start
LH: loop header
LB: loop body
LE: loop exit
PB: predicated region body
PF: predicated region fallthrough
CT: control target
= control target key end

     0   :  { %9 = vsyncpa [#allocation5], 0  ;;  %s269_s0 = inlined_call_operand.hbm [shape: f32[8,32], index: 0, kind: input, shape index: {}]   ;;  %s270_s1 = inlined_call_operand.vmem [shape: f32[1,32], index: 1, kind: input, shape index: {}]   ;;  %s271_s2 = inlined_call_operand.<no memory space> [shape: f32[1,1], index: 2, kind: input, shape index: {}]   ;;  %s272_s3 = inlined_call_operand.hbm [shape: f32[1,8], index: 3, kind: output, shape index: {}]  }
   0x1   :  { %10 = vsyncpa [#allocation6], 0  ;;  %s212_s12 = smov [#allocation4]   ;;  %s164_s16 = scalar_lea.hbm %s269_s0, 128 }
   0x2   :  { %s17_s13 = sshll.u32 %s212_s12, 4  ;;  %p165_p0 = scmp.ne.s32.totalorder %s269_s0, %s164_s16  ;;  %s18_s13 = int_to_ptr.vmem [resolvable:$true] %s17_s13 }
   0x3   :  { %p168_p1 = scmp.lt.u32.totalorder %s164_s16, %s269_s0 }
   0x5   :  { %p170_p2 = pnand %p168_p1, %p165_p0 }
   0x7   :  { %173 = shalt.err (!%p170_p2)
}
   0x8   :  { %s174_s21 = scalar_lea.vmem %s18_s13, 128  ;;  %p179_p4 = scmp.lt.s32.totalorder %s18_s13, %s18_s13 }
   0x9   :  { %p175_p3 = scmp.ne.s32.totalorder %s18_s13, %s174_s21  ;;  %p180_p5 = scmp.lt.s32.totalorder %s174_s21, %s174_s21 }
   0xb   :  { %p181_p6 = por %p180_p5, %p179_p4 }
   0xd   :  { %p182_p7 = pnand %p181_p6, %p175_p3 }
   0xf   :  { %185 = shalt.err (!%p182_p7)
}
  0x10   :  { %20 = dma.hbm_to_vmem [thread:$0]  %s269_s0, 128, %s18_s13, [#allocation5]  }
  0x11   :  { %208 = dma.done.wait [#allocation5], 128  }
  0x12   :  { %209 = vsyncadd [#allocation5], 4294967168  ;;  %vm32_vm0 = vcmask 57344   ;;  %v213_v0 = vmov 0.0   ;;  %vm214_vm1 = vmmov 0   ;;  %vm37_vm2 = vcmask 261120  }
  0x13   :  { %33 = vst.msk [vmem:[#allocation2] sm:$0x1] %vm32_vm0, %v213_v0  ;;  %151 = vmatprep.subr.mxu0 %v213_v0  ;;  %153 = vmatprep.mubr.msk.f32.mxu0 %vm214_vm1, %v213_v0  ;;  %v34_v1 = vld [vmem:[#allocation4] sm:$0xff]  ;;  %v35_v2 = vld [vmem:[%s270_s1] sm:$0x1]  ;;  %v122_v7 = vstv %s271_s2  ;;  %s215_s27 = smov [#allocation7]  }
  0x14   :  { %152 = vmatpush3.xpose.msk.msra.mxu0 %vm37_vm2, %v34_v1  ;;  %s137_s1 = sshll.u32 %s215_s27, 4  ;;  %s138_s1 = int_to_ptr.vmem [resolvable:$true] %s137_s1 }
  0x15   :  { %s186_s28 = scalar_lea.vmem %s138_s1, 16  ;;  %s190_s29 = scalar_lea.vmem %s138_s1, 32 }
  0x16   :  { %p187_p8 = scmp.ne.s32.totalorder %s138_s1, %s186_s28  ;;  %p191_p9 = scmp.lt.s32.totalorder %s138_s1, %s138_s1 }
  0x17   :  { %154 = vmatmul.mubr.msk.f32.vlgmr.msra.gmra.mrb[0].mxu0 %vm37_vm2, %v35_v2  ;;  %p192_p10 = scmp.lt.s32.totalorder %s190_s29, %s186_s28 }
  0x19   :  { %p193_p11 = por %p192_p10, %p191_p9 }
  0x1a   :  { %v36_v3 = vld [vmem:[#allocation2] sm:$0x1] }
  0x1b   :  { %p194_p12 = pnand %p193_p11, %p187_p8 }
  0xea   :  { %v110_v4 = vpop.f32.mrb[0].mxu0 }
  0xeb   :  { %v114_v5 = vadd.f32 %v110_v4, %v36_v3  ;;  %v155_v6 = vpop.f32.mrb[1].mxu0 }
  0xed   :  { %116 = vst.msk [vmem:[#allocation2] sm:$0x1] %vm32_vm0, %v114_v5 }
  0xf4   :  { %v120_v8 = vld [vmem:[#allocation2] sm:$0x1] }
  0xf5   :  { %v123_v9 = vadd.f32 %v122_v7, %v120_v8 }
  0xf7   :  { %v148_v10 = vmul.f32 -1.442695, %v123_v9 }
  0xf9   :  { %160 = vpow2.f32 %v148_v10 }
 0x103   :  { %v161_v11 = vpop.eup %160 }
 0x104   :  { %v127_v12 = vadd.f32 1.0, %v161_v11 }
 0x106   :  { %162 = vrcp.f32 %v127_v12 }
 0x110   :  { %v163_v13 = vpop.eup %162 }
 0x111   :  { %130 = vst.msk [vmem:[#allocation7] sm:$0x1] %vm32_vm0, %v163_v13 }
 0x112   :  { %197 = shalt.err (!%p194_p12)
}
 0x113   :  { %s198_s4 = scalar_lea.hbm %s272_s3, 16 }
 0x114   :  { %p199_p13 = scmp.ne.s32.totalorder %s272_s3, %s198_s4  ;;  %p202_p0 = scmp.lt.u32.totalorder %s198_s4, %s272_s3 }
 0x116   :  { %p204_p1 = pnand %p202_p0, %p199_p13 }
 0x118   :  { %207 = shalt.err (!%p204_p1)
}
 0x119   :  { %140 = dma.vmem_to_hbm [thread:$0]  %s138_s1, 16, %s272_s3, [#allocation6]  }
 0x11a   :  { %210 = dma.done.wait [#allocation6], 16  }
 0x11b   :  { %211 = vsyncadd [#allocation6], 4294967280 }
 0x11c   :  { %144 = vsyncpa [#allocation5], 1 }
 0x11d   :  { %145 = vsyncpa [#allocation6], 1 }

</bundles_post_ra>
